<compile_context>
chip_gen: v7x
topology: tpu7x:2x2x1
jax: 0.10.0
libtpu: 0.0.40
codegen_flags: <defaults>
</compile_context>

<pallas_src>
import functools

import jax
import jax.numpy as jnp
from jax.experimental import pallas as pl
from jax.experimental.pallas import tpu as pltpu


_SUBLANE = 16   # safe sublane multiple for both f32 (8) and bf16 (16) tiles
_LANE = 128


def _round_up(a, b):
    return (a + b - 1) // b * b


def _cdiv(a, b):
    return (a + b - 1) // b


def _vmem_budget_bytes(frac=0.80):
    """Generation-aware VMEM budget (v5e/v6e: 128 MiB, v7x: 64 MiB per core)."""
    try:
        cap = int(pltpu.get_tpu_info().vmem_capacity_bytes)
    except Exception:
        cap = 64 * 1024 * 1024   # conservative fallback (v7x per-TensorCore)
    return int(frac * cap)


# --------------------------------------------------------------------------- #
# Kernels
# --------------------------------------------------------------------------- #
def _resident_chain_kernel(x_ref, w_ref, o_ref):
    """All L weights resident in VMEM; one row tile of x per grid step.

    x_ref : (TM, Hp)     row tile of the flattened activations (any dtype)
    w_ref : (L, Hp, Hp)  merged attention+ffn weight stack (compute dtype)
    o_ref : (TM, Hp)     output row tile (original dtype)
    """
    cdt = w_ref.dtype
    y = x_ref[...].astype(cdt)          # in-kernel cast, hidden under MXU work
    for l in range(w_ref.shape[0]):     # sequential chain: one live temp at a time
        y = jnp.dot(y, w_ref[l], preferred_element_type=jnp.float32).astype(cdt)
    o_ref[...] = y.astype(o_ref.dtype)


def _streaming_chain_kernel(x_ref, w_ref, o_ref, acc_ref):
    """One weight layer per grid step; the weight DMA for layer l+1 overlaps the
    matmul for layer l.  The running activation stays resident in VMEM scratch
    across the (inner, 'arbitrary') layer axis.

    x_ref  : (TM, Hp)    row tile (block index constant across the layer axis)
    w_ref  : (1, Hp, Hp) weight for the current layer (compute dtype)
    o_ref  : (TM, Hp)    output row tile (written at the last layer)
    acc_ref: (TM, Hp)    running value in compute dtype
    """
    cdt = w_ref.dtype
    l = pl.program_id(1)

    @pl.when(l == 0)
    def _():
        acc_ref[...] = x_ref[...].astype(cdt)

    y = jnp.dot(acc_ref[...], w_ref[0], preferred_element_type=jnp.float32)
    acc_ref[...] = y.astype(cdt)

    @pl.when(l == pl.num_programs(1) - 1)
    def _():
        o_ref[...] = acc_ref[...].astype(o_ref.dtype)


# --------------------------------------------------------------------------- #
# Jitted forward
# --------------------------------------------------------------------------- #
@functools.partial(
    jax.jit, static_argnames=("vmem_budget", "tile_m_cap", "force_streaming"))
def _forward(x, w, *, vmem_budget, tile_m_cap, force_streaming):
    B, S, H = x.shape
    L, Hp, _ = w.shape
    out_dtype = x.dtype
    cdt = w.dtype
    csize = jnp.dtype(cdt).itemsize
    x_isize = jnp.dtype(x.dtype).itemsize
    o_isize = jnp.dtype(out_dtype).itemsize

    M = B * S
    # Large MXU-friendly row tile; keep >= 2 tiles when possible so both v7x
    # TensorCores get work under dimension_semantics=("parallel", ...).
    tile_m = _round_up(min(int(tile_m_cap), _round_up(M, _SUBLANE)), _SUBLANE)
    if M > _SUBLANE and _cdiv(M, tile_m) < 2:
        tile_m = _round_up(_cdiv(M, 2), _SUBLANE)

    def _tile_bytes(tm):
        # double-buffered x tiles + out tiles + acc/chain temp + f32 dot results
        return (2 * tm * Hp * x_isize + 2 * tm * Hp * o_isize
                + tm * Hp * csize + 3 * tm * Hp * 4)

    resident_w_bytes = 2 * L * Hp * Hp * csize   # pipeliner may double-buffer
    stream_w_bytes = 2 * Hp * Hp * csize         # one layer, double-buffered

    use_streaming = bool(force_streaming) or (
        resident_w_bytes + _tile_bytes(tile_m) > vmem_budget)
    w_bytes = stream_w_bytes if use_streaming else resident_w_bytes
    while tile_m > _SUBLANE and w_bytes + _tile_bytes(tile_m) > vmem_budget:
        tile_m = _round_up(tile_m // 2, _SUBLANE)

    Mp = _round_up(M, tile_m)

    x2 = x.reshape(M, H)
    if Mp != M or Hp != H:
        # Pad is required anyway; pre-cast so the padded slab is written at
        # compute width (fewer HBM bytes).  Otherwise x passes through in its
        # original dtype and the kernel does the cast.
        x2 = jnp.pad(x2.astype(cdt), ((0, Mp - M), (0, Hp - H)))

    vmem_limit = int(max(vmem_budget, 32 * 1024 * 1024))

    if use_streaming:
        out2 = pl.pallas_call(
            _streaming_chain_kernel,
            out_shape=jax.ShapeDtypeStruct((Mp, Hp), out_dtype),
            grid_spec=pltpu.PrefetchScalarGridSpec(
                num_scalar_prefetch=0,
                grid=(Mp // tile_m, L),
                in_specs=[
                    pl.BlockSpec((tile_m, Hp), lambda m, l: (m, 0)),
                    pl.BlockSpec((1, Hp, Hp), lambda m, l: (l, 0, 0)),
                ],
                out_specs=pl.BlockSpec((tile_m, Hp), lambda m, l: (m, 0)),
                scratch_shapes=[pltpu.VMEM((tile_m, Hp), cdt)],
            ),
            compiler_params=pltpu.CompilerParams(
                dimension_semantics=("parallel", "arbitrary"),
                vmem_limit_bytes=vmem_limit,
            ),
        )(x2, w)
    else:
        out2 = pl.pallas_call(
            _resident_chain_kernel,
            out_shape=jax.ShapeDtypeStruct((Mp, Hp), out_dtype),
            grid_spec=pltpu.PrefetchScalarGridSpec(
                num_scalar_prefetch=0,
                grid=(Mp // tile_m,),
                in_specs=[
                    pl.BlockSpec((tile_m, Hp), lambda m: (m, 0)),
                    pl.BlockSpec((L, Hp, Hp), lambda m: (0, 0, 0)),
                ],
                out_specs=pl.BlockSpec((tile_m, Hp), lambda m: (m, 0)),
            ),
            compiler_params=pltpu.CompilerParams(
                dimension_semantics=("parallel",),
                vmem_limit_bytes=vmem_limit,
            ),
        )(x2, w)

    return out2[:M, :H].reshape(B, S, H)


# --------------------------------------------------------------------------- #
# Public wrappers
# --------------------------------------------------------------------------- #
def make_distributed_transformer_layer(attn_w, ffn_w, *, compute_dtype=jnp.bfloat16,
                                       tile_m_cap=512, force_streaming=False):
    """Prepare weights once (cast + lane-pad + merge) and return apply(x).

    attn_w: (La, H, H), ffn_w: (Lf, H, H)  ->  apply(x: (B, S, H)) -> (B, S, H)
    Intermediates between links are rounded to `compute_dtype` (bf16 default).
    """
    attn_w = jnp.asarray(attn_w)
    ffn_w = jnp.asarray(ffn_w)
    assert attn_w.ndim == 3 and ffn_w.ndim == 3
    H = attn_w.shape[-1]
    assert attn_w.shape[1:] == (H, H) and ffn_w.shape[1:] == (H, H)
    assert attn_w.shape[0] >= 1 and ffn_w.shape[0] >= 1

    cdt = jnp.dtype(compute_dtype)
    Hp = _round_up(H, _LANE)
    # One-time weight prep, hoisted out of the per-call path.
    w = jnp.concatenate([attn_w, ffn_w], axis=0).astype(cdt)
    if Hp != H:
        w = jnp.pad(w, ((0, 0), (0, Hp - H), (0, Hp - H)))

    budget = _vmem_budget_bytes()

    def apply(x):
        assert x.ndim == 3 and x.shape[-1] == H
        return _forward(x, w, vmem_budget=budget, tile_m_cap=int(tile_m_cap),
                        force_streaming=bool(force_streaming))

    return apply


def distributed_transformer_layer(x, attn_w, ffn_w, **kwargs):
    """One-shot convenience wrapper (prefer make_... for repeated calls)."""
    return make_distributed_transformer_layer(attn_w, ffn_w, **kwargs)(x)


def _reference(x, attn_w, ffn_w, compute_dtype=jnp.float32):
    """Plain-XLA reference for the same matmul chain."""
    y = x.astype(compute_dtype)
    for i in range(attn_w.shape[0]):
        y = jnp.dot(y, attn_w[i].astype(compute_dtype),
                    preferred_element_type=jnp.float32).astype(compute_dtype)
    for i in range(ffn_w.shape[0]):
        y = jnp.dot(y, ffn_w[i].astype(compute_dtype),
                    preferred_element_type=jnp.float32).astype(compute_dtype)
    return y.astype(x.dtype)


if __name__ == "__main__":
    # Small shapes consistent with the module's forward: x [B, S, H], square weights.
    B, S, H = 2, 8, 32
    key = jax.random.PRNGKey(0)
    kx, ka0, ka1, kf0, kf1 = jax.random.split(key, 5)
    scale = 1.0 / float(H) ** 0.5

    x = jax.random.normal(kx, (B, S, H), dtype=jnp.float32)
    attn_w = jnp.stack([
        jax.random.normal(ka0, (H, H), dtype=jnp.float32) * scale,
        jax.random.normal(ka1, (H, H), dtype=jnp.float32) * scale,
    ])
    ffn_w = jnp.stack([
        jax.random.normal(kf0, (H, H), dtype=jnp.float32) * scale,
        jax.random.normal(kf1, (H, H), dtype=jnp.float32) * scale,
    ])

    # Resident-weight path (default for shapes that fit the VMEM budget).
    layer = make_distributed_transformer_layer(attn_w, ffn_w)
    out = jax.block_until_ready(layer(x))
    assert out.shape == (B, S, H)

    # Correctness vs the same bf16 chain computed by XLA (tight).
    ref_bf16 = _reference(x, attn_w, ffn_w, compute_dtype=jnp.bfloat16)
    assert jnp.allclose(out, ref_bf16, atol=5e-2, rtol=5e-2), \
        "mismatch vs bf16-matched reference"

    # Module-semantics sanity check (f32 chain); looser tolerance is the
    # documented bf16 quantization of intermediates, not a bug.
    ref_f32 = _reference(x, attn_w, ffn_w, compute_dtype=jnp.float32)
    assert jnp.allclose(out, ref_f32, atol=2e-1, rtol=1e-1), \
        "mismatch vs f32 reference"

    # Also exercise the layer-streaming path (used when the weight stack
    # exceeds the per-core VMEM budget, e.g. H ~ 4096 on v7x).
    layer_stream = make_distributed_transformer_layer(attn_w, ffn_w,
                                                      force_streaming=True)
    out_stream = jax.block_until_ready(layer_stream(x))
    assert jnp.allclose(out_stream, out, atol=1e-3, rtol=1e-3), \
        "streaming path disagrees with resident path"

    print("KERNEL_OK")
</pallas_src>

<mosaic_0001>
module attributes {stable_mosaic.version = 11 : i64} {
  func.func @_resident_chain_kernel(%arg0: i32, %arg1: memref<16x128xbf16, #tpu.memory_space<vmem>>, %arg2: memref<4x128x128xbf16, #tpu.memory_space<vmem>>, %arg3: memref<16x128xf32, #tpu.memory_space<vmem>>) attributes {dimension_semantics = [#tpu.dimension_semantics<parallel>], iteration_bounds = array<i64: 1>, scalar_prefetch = 0 : i64, scratch_operands = 0 : i64, tpu.core_type = #tpu.core_type<tc>, window_params = [{transform_indices = @transform_0, window_bounds = array<i64: 16, 128>}, {pipeline_mode = #tpu.pipeline_mode<synchronous>, transform_indices = @transform_1, window_bounds = array<i64: 4, 128, 128>}, {transform_indices = @transform_2, window_bounds = array<i64: 16, 128>}]} {
    %c0 = arith.constant 0 : index
    %c0_0 = arith.constant 0 : index
    %0 = vector.load %arg1[%c0, %c0_0] : memref<16x128xbf16, #tpu.memory_space<vmem>>, vector<16x128xbf16>
    %c0_1 = arith.constant 0 : index
    %c0_2 = arith.constant 0 : index
    %c0_3 = arith.constant 0 : index
    %1 = vector.load %arg2[%c0_1, %c0_2, %c0_3] : memref<4x128x128xbf16, #tpu.memory_space<vmem>>, vector<1x128x128xbf16>
    %2 = vector.shape_cast %1 : vector<1x128x128xbf16> to vector<128x128xbf16>
    %cst = arith.constant dense<0.000000e+00> : vector<16x128xf32>
    %3 = tpu.matmul %0, %2, %cst {dimension_numbers = #tpu.dot_dimension_numbers<[1], [0], [0], [1], [0, 0, 1, 1], [], []>} : vector<16x128xbf16>, vector<128x128xbf16>, vector<16x128xf32> -> vector<16x128xf32>
    %4 = arith.truncf %3 : vector<16x128xf32> to vector<16x128xbf16>
    %c1 = arith.constant 1 : index
    %c0_4 = arith.constant 0 : index
    %c0_5 = arith.constant 0 : index
    %5 = vector.load %arg2[%c1, %c0_4, %c0_5] : memref<4x128x128xbf16, #tpu.memory_space<vmem>>, vector<1x128x128xbf16>
    %6 = vector.shape_cast %5 : vector<1x128x128xbf16> to vector<128x128xbf16>
    %cst_6 = arith.constant dense<0.000000e+00> : vector<16x128xf32>
    %7 = tpu.matmul %4, %6, %cst_6 {dimension_numbers = #tpu.dot_dimension_numbers<[1], [0], [0], [1], [0, 0, 1, 1], [], []>} : vector<16x128xbf16>, vector<128x128xbf16>, vector<16x128xf32> -> vector<16x128xf32>
    %8 = arith.truncf %7 : vector<16x128xf32> to vector<16x128xbf16>
    %c2 = arith.constant 2 : index
    %c0_7 = arith.constant 0 : index
    %c0_8 = arith.constant 0 : index
    %9 = vector.load %arg2[%c2, %c0_7, %c0_8] : memref<4x128x128xbf16, #tpu.memory_space<vmem>>, vector<1x128x128xbf16>
    %10 = vector.shape_cast %9 : vector<1x128x128xbf16> to vector<128x128xbf16>
    %cst_9 = arith.constant dense<0.000000e+00> : vector<16x128xf32>
    %11 = tpu.matmul %8, %10, %cst_9 {dimension_numbers = #tpu.dot_dimension_numbers<[1], [0], [0], [1], [0, 0, 1, 1], [], []>} : vector<16x128xbf16>, vector<128x128xbf16>, vector<16x128xf32> -> vector<16x128xf32>
    %12 = arith.truncf %11 : vector<16x128xf32> to vector<16x128xbf16>
    %c3 = arith.constant 3 : index
    %c0_10 = arith.constant 0 : index
    %c0_11 = arith.constant 0 : index
    %13 = vector.load %arg2[%c3, %c0_10, %c0_11] : memref<4x128x128xbf16, #tpu.memory_space<vmem>>, vector<1x128x128xbf16>
    %14 = vector.shape_cast %13 : vector<1x128x128xbf16> to vector<128x128xbf16>
    %cst_12 = arith.constant dense<0.000000e+00> : vector<16x128xf32>
    %15 = tpu.matmul %12, %14, %cst_12 {dimension_numbers = #tpu.dot_dimension_numbers<[1], [0], [0], [1], [0, 0, 1, 1], [], []>} : vector<16x128xbf16>, vector<128x128xbf16>, vector<16x128xf32> -> vector<16x128xf32>
    %16 = arith.truncf %15 : vector<16x128xf32> to vector<16x128xbf16>
    %17 = arith.extf %16 : vector<16x128xbf16> to vector<16x128xf32>
    %c0_13 = arith.constant 0 : index
    %c0_14 = arith.constant 0 : index
    %18 = vector.load %arg3[%c0_13, %c0_14] : memref<16x128xf32, #tpu.memory_space<vmem>>, vector<16x128xf32>
    tpu.vector_store %arg3[%c0_13, %c0_14], %17 {strides = array<i32>} : memref<16x128xf32, #tpu.memory_space<vmem>>, vector<16x128xf32>,
    return
  }
  func.func @transform_0(%arg0: i32) -> (i32, i32) {
    %c0_i32 = arith.constant 0 : i32
    %c0_i32_0 = arith.constant 0 : i32
    return %arg0, %c0_i32 : i32, i32
  }
  func.func @transform_1(%arg0: i32) -> (i32, i32, i32) {
    %c0_i32 = arith.constant 0 : i32
    %c0_i32_0 = arith.constant 0 : i32
    %c0_i32_1 = arith.constant 0 : i32
    %c0_i32_2 = arith.constant 0 : i32
    return %c0_i32, %c0_i32_0, %c0_i32_1 : i32, i32, i32
  }
  func.func @transform_2(%arg0: i32) -> (i32, i32) {
    %c0_i32 = arith.constant 0 : i32
    %c0_i32_0 = arith.constant 0 : i32
    return %arg0, %c0_i32 : i32, i32
  }
}

</mosaic_0001>

<bundles_post_ra>
// kernel: _forward.1
= control target key start
LH: loop header
LB: loop body
LE: loop exit
PB: predicated region body
PF: predicated region fallthrough
CT: control target
= control target key end

     0   :  { %7 = vsyncpa [#allocation3], 0  ;;  %s681_s9 = smov [#allocation2]   ;;  %s762_s0 = inlined_call_operand.vmem [shape: bf16[16,128], index: 0, kind: input, shape index: {}]   ;;  %s763_s1 = inlined_call_operand.hbm [shape: bf16[4,128,128], index: 1, kind: input, shape index: {}]   ;;  %s764_s2 = inlined_call_operand.vmem [shape: f32[16,128], index: 2, kind: output, shape index: {}]  }
   0x1   :  { %s15_s10 = sshll.u32 %s681_s9, 4  ;;  %s657_s13 = scalar_lea.hbm %s763_s1, 4096  ;;  %s16_s10 = int_to_ptr.vmem [resolvable:$true] %s15_s10 }
   0x2   :  { %p658_p0 = scmp.ne.s32.totalorder %s763_s1, %s657_s13  ;;  %p661_p1 = scmp.lt.u32.totalorder %s657_s13, %s763_s1 }
   0x4   :  { %p663_p2 = pnand %p661_p1, %p658_p0 }
   0x6   :  { %666 = shalt.err (!%p663_p2)
}
   0x7   :  { %s667_s18 = scalar_lea.vmem %s16_s10, 4096  ;;  %p672_p4 = scmp.lt.s32.totalorder %s16_s10, %s16_s10 }
   0x8   :  { %p668_p3 = scmp.ne.s32.totalorder %s16_s10, %s667_s18  ;;  %p673_p5 = scmp.lt.s32.totalorder %s667_s18, %s667_s18 }
   0xa   :  { %p674_p6 = por %p673_p5, %p672_p4 }
   0xc   :  { %p675_p7 = pnand %p674_p6, %p668_p3 }
   0xe   :  { %678 = shalt.err (!%p675_p7)
}
   0xf   :  { %s682_s19 = smov 64   ;;  %s683_s20 = smov 4  }
  0x10   :  { %21 = dma.hbm_to_vmem [thread:$0]  %s763_s1, 4096, %s16_s10, [#allocation3], %s682_s19, %s682_s19, %s683_s20  }
  0x11   :  { %679 = dma.done.wait [#allocation3], 4096  }
  0x12   :  { %680 = vsyncadd [#allocation3], 4294963200  ;;  %v684_v0 = vmov 0.0   ;;  %vm685_vm0 = vmmov 0   ;;  %v624_v1 = vld [vmem:[#allocation2] sm:$0xff]   ;;  %v625_v2 = vld [vmem:[#allocation2 + $0x8] sm:$0xff]  }
  0x13   :  { %539 = vmatprep.subr.bf16.mxu0 %v684_v0  ;;  %555 = vmatprep.mubr.msk.bf16.mxu0 %vm685_vm0, %v684_v0  ;;  %v626_v3 = vld [vmem:[#allocation2 + $0x10] sm:$0xff]   ;;  %v633_v4 = vld [vmem:[#allocation2 + $0x40] sm:$0xff]   ;;  %v627_v5 = vld [vmem:[#allocation2 + $0x18] sm:$0xff]  }
  0x14   :  { %559 = vmatprep.subr.bf16.mxu1 %v684_v0  ;;  %575 = vmatprep.mubr.msk.bf16.mxu1 %vm685_vm0, %v684_v0  ;;  %v634_v6 = vld [vmem:[#allocation2 + $0x48] sm:$0xff]   ;;  %v628_v7 = vld [vmem:[#allocation2 + $0x20] sm:$0xff]   ;;  %v635_v8 = vld [vmem:[#allocation2 + $0x50] sm:$0xff]  }
  0x15   :  { %540 = vmatpush3.bf16.msra.mxu0 %v624_v1  ;;  %560 = vmatpush3.bf16.msra.mxu1 %v633_v4  ;;  %v629_v9 = vld [vmem:[#allocation2 + $0x28] sm:$0xff]   ;;  %v636_v10 = vld [vmem:[#allocation2 + $0x58] sm:$0xff]   ;;  %v630_v11 = vld [vmem:[#allocation2 + $0x30] sm:$0xff]  }
  0x16   :  { %541 = vmatprep.subr.bf16.mxu0 %v684_v0  ;;  %561 = vmatprep.subr.bf16.mxu1 %v684_v0  ;;  %v637_v12 = vld [vmem:[#allocation2 + $0x60] sm:$0xff]   ;;  %v631_v13 = vld [vmem:[#allocation2 + $0x38] sm:$0xff]   ;;  %v638_v14 = vld [vmem:[#allocation2 + $0x68] sm:$0xff]  }
  0x17   :  { %v632_v15 = vld [vmem:[%s762_s0] sm:$0xff]   ;;  %v639_v16 = vld [vmem:[#allocation2 + $0x70] sm:$0xff]   ;;  %v640_v17 = vld [vmem:[#allocation2 + $0x78] sm:$0xff]  }
  0x18   :  { %v641_v18 = vld [vmem:[#allocation2 + $0x80] sm:$0xff]   ;;  %v642_v19 = vld [vmem:[#allocation2 + $0x88] sm:$0xff]   ;;  %v643_v20 = vld [vmem:[#allocation2 + $0x90] sm:$0xff]  }
  0x19   :  { %542 = vmatpush3.bf16.msra.mxu0 %v625_v2  ;;  %562 = vmatpush3.bf16.msra.mxu1 %v634_v6  ;;  %v644_v21 = vld [vmem:[#allocation2 + $0x98] sm:$0xff]   ;;  %v645_v22 = vld [vmem:[#allocation2 + $0xa0] sm:$0xff]   ;;  %v646_v23 = vld [vmem:[#allocation2 + $0xa8] sm:$0xff]  }
  0x1a   :  { %543 = vmatprep.subr.bf16.mxu0 %v684_v0  ;;  %563 = vmatprep.subr.bf16.mxu1 %v684_v0  ;;  %v647_v24 = vld [vmem:[#allocation2 + $0xb0] sm:$0xff]   ;;  %v648_v30 = vld [vmem:[#allocation2 + $0xb8] sm:$0xff]   ;;  %v649_v31 = vld [vmem:[#allocation2 + $0xc0] sm:$0xff]  }
  0x1b   :  { %v650_v32 = vld [vmem:[#allocation2 + $0xc8] sm:$0xff]   ;;  %v651_v33 = vld [vmem:[#allocation2 + $0xd0] sm:$0xff]   ;;  %v652_v34 = vld [vmem:[#allocation2 + $0xd8] sm:$0xff]  }
  0x1c   :  { %v653_v35 = vld [vmem:[#allocation2 + $0xe0] sm:$0xff]   ;;  %v654_v36 = vld [vmem:[#allocation2 + $0xe8] sm:$0xff]   ;;  %v655_v37 = vld [vmem:[#allocation2 + $0xf0] sm:$0xff]  }
  0x1d   :  { %544 = vmatpush3.bf16.msra.mxu0 %v626_v3  ;;  %564 = vmatpush3.bf16.msra.mxu1 %v635_v8  ;;  %v656_v43 = vld [vmem:[#allocation2 + $0xf8] sm:$0xff]  }
  0x1e   :  { %545 = vmatprep.subr.bf16.mxu0 %v684_v0  ;;  %565 = vmatprep.subr.bf16.mxu1 %v684_v0 }
  0x21   :  { %546 = vmatpush3.bf16.msra.mxu0 %v627_v5  ;;  %566 = vmatpush3.bf16.msra.mxu1 %v636_v10 }
  0x22   :  { %547 = vmatprep.subr.bf16.mxu0 %v684_v0  ;;  %567 = vmatprep.subr.bf16.mxu1 %v684_v0 }
  0x25   :  { %548 = vmatpush3.bf16.msra.mxu0 %v628_v7  ;;  %568 = vmatpush3.bf16.msra.mxu1 %v637_v12 }
  0x26   :  { %549 = vmatprep.subr.bf16.mxu0 %v684_v0  ;;  %569 = vmatprep.subr.bf16.mxu1 %v684_v0 }
  0x29   :  { %550 = vmatpush3.bf16.msra.mxu0 %v629_v9  ;;  %570 = vmatpush3.bf16.msra.mxu1 %v638_v14 }
  0x2a   :  { %551 = vmatprep.subr.bf16.mxu0 %v684_v0  ;;  %571 = vmatprep.subr.bf16.mxu1 %v684_v0 }
  0x2d   :  { %552 = vmatpush3.bf16.msra.mxu0 %v630_v11  ;;  %572 = vmatpush3.bf16.msra.mxu1 %v639_v16 }
  0x2e   :  { %553 = vmatprep.subr.bf16.mxu0 %v684_v0  ;;  %573 = vmatprep.subr.bf16.mxu1 %v684_v0 }
  0x31   :  { %554 = vmatpush3.bf16.msra.mxu0 %v631_v13  ;;  %574 = vmatpush3.bf16.msra.mxu1 %v640_v17 }
  0x32   :  { %579 = vmatprep.subr.bf16.mxu0 %v684_v0  ;;  %599 = vmatprep.subr.bf16.mxu1 %v684_v0 }
  0x34   :  { %556 = vmatmul.mubr.bf16.vlgmr.msra.gmra.mrb[0].mxu0 %v632_v15 }
  0x35   :  { %595 = vmatprep.mubr.msk.bf16.mxu0 %vm685_vm0, %v684_v0  ;;  %580 = vmatpush3.bf16.msra.mxu0 %v641_v18 }
  0x36   :  { %581 = vmatprep.subr.bf16.mxu0 %v684_v0 }
  0x39   :  { %582 = vmatpush3.bf16.msra.mxu0 %v642_v19 }
  0x3a   :  { %583 = vmatprep.subr.bf16.mxu0 %v684_v0 }
  0x3d   :  { %584 = vmatpush3.bf16.msra.mxu0 %v643_v20 }
  0x3e   :  { %585 = vmatprep.subr.bf16.mxu0 %v684_v0 }
  0x41   :  { %586 = vmatpush3.bf16.msra.mxu0 %v644_v21 }
  0x42   :  { %587 = vmatprep.subr.bf16.mxu0 %v684_v0 }
  0x45   :  { %588 = vmatpush3.bf16.msra.mxu0 %v645_v22 }
  0x46   :  { %589 = vmatprep.subr.bf16.mxu0 %v684_v0 }
  0x49   :  { %590 = vmatpush3.bf16.msra.mxu0 %v646_v23 }
  0x4a   :  { %591 = vmatprep.subr.bf16.mxu0 %v684_v0 }
  0x4d   :  { %592 = vmatpush3.bf16.msra.mxu0 %v647_v24 }
  0x4e   :  { %593 = vmatprep.subr.bf16.mxu0 %v684_v0 }
  0x51   :  { %594 = vmatpush3.bf16.msra.mxu0 %v648_v30 }
 0x107   :  { %v132_v25 = vpop.f32.mrb[0].mxu0 }
 0x108   :  { %v557_v26 = vpop.f32.mrb[1].mxu0 }
 0x109   :  { %v135_v27 = vpop.f32.mrb[2].mxu0 }
 0x10a   :  { %v139_v28 = vpack.c.bf16 %v135_v27, %v132_v25  ;;  %v558_v29 = vpop.f32.mrb[3].mxu0 }
 0x10c   :  { %576 = vmatmul.mubr.bf16.vlgmr.msra.gmra.mrb[0].mxu1 %v139_v28 }
 0x10d   :  { %615 = vmatprep.mubr.msk.bf16.mxu1 %vm685_vm0, %v684_v0  ;;  %600 = vmatpush3.bf16.msra.mxu1 %v649_v31 }
 0x10e   :  { %601 = vmatprep.subr.bf16.mxu1 %v684_v0 }
 0x111   :  { %602 = vmatpush3.bf16.msra.mxu1 %v650_v32 }
 0x112   :  { %603 = vmatprep.subr.bf16.mxu1 %v684_v0 }
 0x115   :  { %604 = vmatpush3.bf16.msra.mxu1 %v651_v33 }
 0x116   :  { %605 = vmatprep.subr.bf16.mxu1 %v684_v0 }
 0x119   :  { %606 = vmatpush3.bf16.msra.mxu1 %v652_v34 }
 0x11a   :  { %607 = vmatprep.subr.bf16.mxu1 %v684_v0 }
 0x11d   :  { %608 = vmatpush3.bf16.msra.mxu1 %v653_v35 }
 0x11e   :  { %609 = vmatprep.subr.bf16.mxu1 %v684_v0 }
 0x121   :  { %610 = vmatpush3.bf16.msra.mxu1 %v654_v36 }
 0x122   :  { %611 = vmatprep.subr.bf16.mxu1 %v684_v0 }
 0x125   :  { %612 = vmatpush3.bf16.msra.mxu1 %v655_v37 }
 0x126   :  { %613 = vmatprep.subr.bf16.mxu1 %v684_v0 }
 0x129   :  { %614 = vmatpush3.bf16.msra.mxu1 %v656_v43 }
 0x1df   :  { %v239_v38 = vpop.f32.mrb[0].mxu1 }
 0x1e0   :  { %v577_v39 = vpop.f32.mrb[1].mxu1 }
 0x1e1   :  { %v242_v40 = vpop.f32.mrb[2].mxu1 }
 0x1e2   :  { %v246_v41 = vpack.c.bf16 %v242_v40, %v239_v38  ;;  %v578_v42 = vpop.f32.mrb[3].mxu1 }
 0x1e4   :  { %596 = vmatmul.mubr.bf16.vlgmr.msra.gmra.mrb[4].mxu0 %v246_v41 }
 0x2b7   :  { %v346_v44 = vpop.f32.mrb[4].mxu0 }
 0x2b8   :  { %v597_v45 = vpop.f32.mrb[5].mxu0 }
 0x2b9   :  { %v349_v46 = vpop.f32.mrb[6].mxu0 }
 0x2ba   :  { %v353_v47 = vpack.c.bf16 %v349_v46, %v346_v44  ;;  %v598_v48 = vpop.f32.mrb[7].mxu0 }
 0x2bc   :  { %616 = vmatmul.mubr.bf16.vlgmr.msra.gmra.mrb[4].mxu1 %v353_v47 }
 0x38f   :  { %v453_v49 = vpop.f32.mrb[4].mxu1 }
 0x390   :  { %v617_v50 = vpop.f32.mrb[5].mxu1 }
 0x391   :  { %v456_v51 = vpop.f32.mrb[6].mxu1 }
 0x392   :  { %v460_v52 = vpack.c.bf16 %v456_v51, %v453_v49  ;;  %v618_v53 = vpop.f32.mrb[7].mxu1 }
 0x394   :  { %v461_v54 = vunpack.c.l.bf16 %v460_v52  ;;  %v462_v55 = vunpack.c.h.bf16 %v460_v52 }
 0x396   :  { %463 = vst [vmem:[%s764_s2] sm:$0xff] %v461_v54  ;;  %464 = vst [vmem:[%s764_s2 + $0x8] sm:$0xff] %v462_v55 }
 0x397   :  { %469 = vsyncpa [#allocation3], 1 }

</bundles_post_ra>
